<compile_context>
chip_gen: v7x
topology: tpu7x:2x2x1
jax: 0.10.0
libtpu: 0.0.40
codegen_flags: <defaults>
</compile_context>

<pallas_src>
import math

import jax
import jax.numpy as jnp
from jax.experimental import pallas as pl
from jax.experimental.pallas import tpu as pltpu


def _cdiv(a: int, b: int) -> int:
    return -(-a // b)


def pe_add_kernel(x_ref, pe_ref, o_ref):
    # x_ref : (TM, W) row tile of the flattened input
    # pe_ref: (1, W)  lane-dense PE row (sublane-broadcast by the add)
    o_ref[...] = (x_ref[...].astype(jnp.float32) + pe_ref[...]).astype(o_ref.dtype)


def make_pe(d_model: int, seq_len: int, dtype=jnp.float32):
    """Deterministic buffer init mirroring the PyTorch __init__ exactly.

    NOTE: faithful to the reference (scale applied OUTSIDE the exp, base 1000); exp()
    overflows f32 for d_model >= ~180 -- a source-model quirk kept for parity.
    """
    position = jnp.arange(seq_len, dtype=jnp.float32)[:, None]            # (S_max, 1)
    div_term = jnp.exp(jnp.arange(0, d_model, 2, dtype=jnp.float32)) * (
        -math.log(1000.0) / d_model)                                      # (D/2,)
    ang = position * div_term                                             # (S_max, D/2)
    pe = jnp.zeros((seq_len, d_model), jnp.float32)
    pe = pe.at[:, 0::2].set(jnp.sin(ang))
    pe = pe.at[:, 1::2].set(jnp.cos(ang))
    return pe[None].astype(dtype)                                         # (1, S_max, D)


def positional_encoding_forward(x, pe):
    """x: (B, S, D), pe: (1, S_max, D) with S < S_max (as the reference requires)."""
    B, S, D = x.shape
    # Reference indexes a SINGLE row: self.pe[:, x.shape[1], :] -> shape (1, D).
    # (JAX clamps an out-of-range S silently; PyTorch would raise.)
    pe_row = pe[0, S, :].astype(jnp.float32)                              # (D,)
    out_dtype = jnp.promote_types(x.dtype, jnp.float32)

    in_itemsize = jnp.dtype(x.dtype).itemsize
    out_itemsize = jnp.dtype(out_dtype).itemsize

    # --- Lane-dense 2D view: W = lcm(D, 128) columns; pad the tail once if needed ---
    N = B * S * D
    W = math.lcm(D, 128)
    pad = (-N) % W                       # multiple of D, so the PE pattern stays aligned
    x_flat = x.reshape(-1)
    if pad:
        # A one-time tail pad (rare) beats the ~4.5x masked-vst penalty of a narrow
        # (W = D < 128) output layout applied to every store in the kernel.
        x_flat = jnp.pad(x_flat, (0, pad))
    rows = (N + pad) // W
    x2d = x_flat.reshape(rows, W)
    pe_lane = jnp.tile(pe_row, W // D).reshape(1, W)         # (1, W), VMEM-resident

    # --- Tile sizing from the TOTAL per-step working set (input + promoted output) ---
    SUB = max(8, 32 // in_itemsize)          # sublane packing: 8 f32 / 16 bf16 / 32 int8
    TARGET_STEP_BYTES = 16 * 1024 * 1024     # in-tile + out-tile, single copy (x2 buffered)
    row_bytes = W * (in_itemsize + out_itemsize)
    tm_budget = max(SUB, TARGET_STEP_BYTES // row_bytes)

    n_steps = _cdiv(rows, tm_budget)
    if rows * W * in_itemsize > (1 << 20):
        # Megacore: >= 2 grid steps so ("parallel",) shards across both v7x TensorCores;
        # keep small step counts even so the split is balanced.
        n_steps = max(n_steps, 2)
        if n_steps <= 8 and n_steps % 2 == 1:
            n_steps += 1
    # Rebalance so the last tile is near-full, rounded to the sublane packing.
    tm = min(rows, _cdiv(_cdiv(rows, n_steps), SUB) * SUB)
    grid = (_cdiv(rows, tm),)

    out2d = pl.pallas_call(
        pe_add_kernel,
        out_shape=jax.ShapeDtypeStruct((rows, W), out_dtype),
        grid=grid,
        in_specs=[
            pl.BlockSpec((tm, W), lambda i: (i, 0)),   # streaming row tiles
            pl.BlockSpec((1, W), lambda i: (0, 0)),    # constant -> VMEM-resident PE
        ],
        out_specs=pl.BlockSpec((tm, W), lambda i: (i, 0)),
        compiler_params=pltpu.CompilerParams(
            dimension_semantics=("parallel",),
            vmem_limit_bytes=48 * 1024 * 1024,         # safe on v5e/v6e/v7x (64 MiB/TC)
        ),
        # TODO(synk): when out_dtype == x.dtype, input_output_aliases={0: 0} with a
        # donated x would drop the separate HBM output allocation; left off since XLA
        # silently inserts a defensive copy when x cannot actually be donated.
    )(x2d, pe_lane)

    out_flat = out2d.reshape(-1)
    if pad:
        out_flat = out_flat[:N]
    # TODO(synk): reference stores `self.dropout` as a float (calling it would raise in
    # PyTorch); nn.Dropout in eval mode is identity, so dropout is a no-op here.
    return out_flat.reshape(B, S, D)


if __name__ == "__main__":
    key = jax.random.PRNGKey(0)
    B, S, D = 2, 8, 32          # batch, sequence length, embedding dim
    SEQ_LEN = 16                # max sequence length of the PE buffer (> S)

    x = jax.random.normal(key, (B, S, D), dtype=jnp.float32)
    pe = make_pe(D, SEQ_LEN)

    fwd = jax.jit(positional_encoding_forward)
    out = fwd(x, pe)
    jax.block_until_ready(out)

    # Pure-JAX reference (same semantics as the PyTorch forward at inference).
    ref = x + pe[:, S, :]       # (B,S,D) + (1,D) broadcast
    assert out.shape == ref.shape, "shape mismatch vs reference"
    assert jnp.allclose(out, ref, atol=1e-6), "mismatch vs reference"

    print("KERNEL_OK")
</pallas_src>

<mosaic_0001>
module attributes {stable_mosaic.version = 11 : i64} {
  func.func @pe_add_kernel(%arg0: i32, %arg1: memref<4x128xf32, #tpu.memory_space<vmem>>, %arg2: memref<1x128xf32, #tpu.memory_space<vmem>>, %arg3: memref<4x128xf32, #tpu.memory_space<vmem>>) attributes {dimension_semantics = [#tpu.dimension_semantics<parallel>], iteration_bounds = array<i64: 1>, scalar_prefetch = 0 : i64, scratch_operands = 0 : i64, tpu.core_type = #tpu.core_type<tc>, window_params = [{transform_indices = @transform_0, window_bounds = array<i64: 4, 128>}, {pipeline_mode = #tpu.pipeline_mode<synchronous>, transform_indices = @transform_1, window_bounds = array<i64: 1, 128>}, {transform_indices = @transform_2, window_bounds = array<i64: 4, 128>}]} {
    %c0 = arith.constant 0 : index
    %c0_0 = arith.constant 0 : index
    %0 = vector.load %arg1[%c0, %c0_0] : memref<4x128xf32, #tpu.memory_space<vmem>>, vector<4x128xf32>
    %c0_1 = arith.constant 0 : index
    %c0_2 = arith.constant 0 : index
    %1 = vector.load %arg2[%c0_1, %c0_2] : memref<1x128xf32, #tpu.memory_space<vmem>>, vector<1x128xf32>
    %2 = vector.broadcast %1 : vector<1x128xf32> to vector<4x128xf32>
    %3 = arith.addf %0, %2 : vector<4x128xf32>
    %c0_3 = arith.constant 0 : index
    %c0_4 = arith.constant 0 : index
    %4 = vector.load %arg3[%c0_3, %c0_4] : memref<4x128xf32, #tpu.memory_space<vmem>>, vector<4x128xf32>
    tpu.vector_store %arg3[%c0_3, %c0_4], %3 {strides = array<i32>} : memref<4x128xf32, #tpu.memory_space<vmem>>, vector<4x128xf32>,
    return
  }
  func.func @transform_0(%arg0: i32) -> (i32, i32) {
    %c0_i32 = arith.constant 0 : i32
    %c0_i32_0 = arith.constant 0 : i32
    return %arg0, %c0_i32 : i32, i32
  }
  func.func @transform_1(%arg0: i32) -> (i32, i32) {
    %c0_i32 = arith.constant 0 : i32
    %c0_i32_0 = arith.constant 0 : i32
    %c0_i32_1 = arith.constant 0 : i32
    return %c0_i32, %c0_i32_0 : i32, i32
  }
  func.func @transform_2(%arg0: i32) -> (i32, i32) {
    %c0_i32 = arith.constant 0 : i32
    %c0_i32_0 = arith.constant 0 : i32
    return %arg0, %c0_i32 : i32, i32
  }
}

</mosaic_0001>

<bundles_post_ra>
// kernel: tile.6
= control target key start
LH: loop header
LB: loop body
LE: loop exit
PB: predicated region body
PF: predicated region fallthrough
CT: control target
= control target key end

     0   :  { %s22_s0 = inlined_call_operand.vmem [shape: f32[32], index: 0, kind: input, shape index: {}]   ;;  %s23_s1 = inlined_call_operand.vmem [shape: f32[4,32], index: 1, kind: output, shape index: {}]  }
   0x1   :  { %v4_v0 = vld [vmem:[%s22_s0] ss:$0 sm:$0xff] }
   0x2   :  { %5 = vst [vmem:[%s23_s1] sm:$0xf] %v4_v0 }

// kernel: tile.7
= control target key start
LH: loop header
LB: loop body
LE: loop exit
PB: predicated region body
PF: predicated region fallthrough
CT: control target
= control target key end

     0   :  { %vm7_vm0 = vcmask 261120   ;;  %s37_s8 = smov 32   ;;  %s38_s9 = smov 64   ;;  %vm13_vm1 = vcmask 1048320   ;;  %vm19_vm2 = vcmask 785920   ;;  %vm25_vm3 = vcmask 523520   ;;  %s55_s0 = inlined_call_operand.vmem [shape: f32[4,32], index: 0, kind: input, shape index: {}]   ;;  %s56_s1 = inlined_call_operand.vmem [shape: f32[1,128], index: 1, kind: output, shape index: {}]  }
   0x1   :  { %v4_v0 = vld [vmem:[%s55_s0] sm:$0xf]  ;;  %s36_s0 = smov 96  }
   0x2   :  { %5 = vst [vmem:[#allocation1] sm:$0xf] %v4_v0 }
   0x9   :  { %v10_v1 = vld [vmem:[#allocation1 + $0x3] sm:$0x1]   ;;  %v22_v2 = vld [vmem:[#allocation1 + $0x1] sm:$0x1]   ;;  %v6_v3 = vld [vmem:[#allocation1] sm:$0x1]  }
   0xa   :  { %11 = vrot.lane.b32.xlu0 %v10_v1, %s36_s0  ;;  %23 = vrot.lane.b32.xlu1 %v22_v2, %s37_s8  ;;  %v16_v4 = vld [vmem:[#allocation1 + $0x2] sm:$0x1]   ;;  %8 = vst.msk [vmem:[#allocation0] sm:$0x1] %vm7_vm0, %v6_v3  }
   0xe   :  { %17 = vrot.lane.b32.xlu0 %v16_v4, %s38_s9 }
  0x7c   :  { %v12_v5 = vpop.permute.xlu0 %11   ;;  %v24_v6 = vpop.permute.xlu1 %23  }
  0x7d   :  { %14 = vst.msk [vmem:[#allocation0] sm:$0x1] %vm13_vm1, %v12_v5  }
  0x80   :  { %v18_v7 = vpop.permute.xlu0 %17  }
  0x81   :  { %20 = vst.msk [vmem:[#allocation0] sm:$0x1] %vm19_vm2, %v18_v7  }
  0x82   :  { %26 = vst.msk [vmem:[#allocation0] sm:$0x1] %vm25_vm3, %v24_v6  }
  0x89   :  { %v30_v8 = vld [vmem:[#allocation0] sm:$0x1] }
  0x8a   :  { %32 = vst [vmem:[%s56_s1] sm:$0x1] %v30_v8 }

// kernel: positional_encoding_forward.1
= control target key start
LH: loop header
LB: loop body
LE: loop exit
PB: predicated region body
PF: predicated region fallthrough
CT: control target
= control target key end

     0   :  { %s50_s0 = inlined_call_operand.vmem [shape: f32[4,128], index: 0, kind: input, shape index: {}]   ;;  %s51_s1 = inlined_call_operand.vmem [shape: f32[1,128], index: 1, kind: input, shape index: {}]   ;;  %s52_s2 = inlined_call_operand.vmem [shape: f32[4,128], index: 2, kind: output, shape index: {}]  }
   0x1   :  { %v11_v0 = vld [vmem:[%s50_s0] sm:$0xf] }
   0x2   :  { %v25_v1 = vld [vmem:[%s51_s1] ss:$0 sm:$0xff] }
   0x3   :  { %v19_v2 = vadd.f32 %v25_v1, %v11_v0 }
   0x5   :  { %20 = vst [vmem:[%s52_s2] sm:$0xf] %v19_v2 }

</bundles_post_ra>
